<compile_context>
chip_gen: v7x
topology: tpu7x:2x2x1
jax: 0.10.0
libtpu: 0.0.40
codegen_flags: <defaults>
</compile_context>

<pallas_src>
import jax
import jax.numpy as jnp
from jax import lax
from jax.experimental import pallas as pl
from jax.experimental.pallas import tpu as pltpu

_INV_SQRT2 = 0.7071067811865476  # 1/sqrt(2), hoisted constant


def _gelu_exact(v):
    # PyTorch nn.GELU() default = exact erf formulation.
    return 0.5 * v * (1.0 + lax.erf(v * _INV_SQRT2))


def _mlp_kernel(xT_ref, tT_ref,
                w1xT_ref, w1tT_ref,
                wmidT_ref, bh_ref,
                w5T_ref, b5T_ref,
                oT_ref):
    # Transposed dataflow: batch is on the lane axis.
    # Layer 1 with the concat folded in:
    #   (concat([x, t], -1) @ W1)^T == W1[:dim]^T @ x^T + W1[dim]^T * t^T
    h = (jnp.dot(w1xT_ref[...], xT_ref[...], preferred_element_type=jnp.float32)
         + w1tT_ref[...] * tT_ref[...]          # (H,1)*(1,tm) outer broadcast
         + bh_ref[0])                           # (H,1) bias, lane-broadcast
    h = _gelu_exact(h)

    # Three hidden->hidden blocks; transposed weights packed as one (3, H, H)
    # blob, biases 1..4 packed as one (4, H, 1) blob (static-indexed, unrolled).
    for i in range(3):
        h = jnp.dot(wmidT_ref[i], h, preferred_element_type=jnp.float32) + bh_ref[i + 1]
        h = _gelu_exact(h)

    # Output projection: (out_dim, H) @ (H, tm) -> (out_dim, tm).
    # Lane-dense (tm on lanes) so the store is an unmasked vst.
    out = jnp.dot(w5T_ref[...], h, preferred_element_type=jnp.float32) + b5T_ref[...]
    oT_ref[...] = out.astype(oT_ref.dtype)


def prepare_params(params, input_dim):
    """One-time packing/transposition of the weights (hoisted out of the hot path)."""
    (w1, b1), (w2, b2), (w3, b3), (w4, b4), (w5, b5) = params
    hidden = w1.shape[1]
    out_dim = w5.shape[1]
    # Split W1 into its x-part and t-part (fuses the concat into the kernel),
    # then transpose everything for the batch-on-lanes dataflow.
    w1xT = jnp.transpose(w1[:input_dim, :])               # (H, dim)
    w1tT = jnp.transpose(w1[input_dim:input_dim + 1, :])  # (H, 1)
    wmidT = jnp.stack([w2.T, w3.T, w4.T], axis=0)         # (3, H, H)
    bh = jnp.stack([b1.reshape(hidden, 1), b2.reshape(hidden, 1),
                    b3.reshape(hidden, 1), b4.reshape(hidden, 1)], axis=0)  # (4, H, 1)
    w5T = jnp.transpose(w5)                                # (out_dim, H)
    b5T = b5.reshape(out_dim, 1)                           # (out_dim, 1)
    return dict(w1xT=w1xT, w1tT=w1tT, wmidT=wmidT, bh=bh, w5T=w5T, b5T=b5T)


def _round_up(n, m):
    return ((n + m - 1) // m) * m


def _pick_tile(bsz, block_m):
    # Small batches: single full tile (lane dim == full array -> layout-legal).
    if bsz <= 256:
        return bsz
    # Large batches: multiple-of-128 lane tiles, and at least 2 grid steps so
    # the "parallel" batch axis can be sharded across v7x's two TensorCores.
    return min(block_m, _round_up(pl.cdiv(bsz, 2), 128))


def model_forward(x, t, prepared, *, block_m=4096):
    """x: (bsz, dim) f32, t: (bsz,) f32. Returns (bsz, dim) f32."""
    bsz, dim = x.shape
    hidden = prepared["w1xT"].shape[0]
    out_dim = prepared["w5T"].shape[0]
    assert out_dim == dim, "Model.forward reshapes to (bsz, dim); needs output_dim == dim"

    # Layout plumbing only: put batch on the lane (last) axis.
    xT = jnp.transpose(x)          # (dim, bsz)
    tT = t.reshape(1, bsz)         # (1, bsz)

    tm = _pick_tile(bsz, block_m)
    grid = (pl.cdiv(bsz, tm),)

    def resident(arr):
        # Weight/bias blocks: whole array, same block every grid step
        # (loaded once, stays resident in VMEM across the batch loop).
        n = arr.ndim
        return pl.BlockSpec(arr.shape, lambda i, _n=n: (0,) * _n)

    cost = pl.CostEstimate(
        flops=2 * bsz * ((dim + 1) * hidden + 3 * hidden * hidden + hidden * out_dim),
        transcendentals=4 * bsz * hidden,
        bytes_accessed=4 * (bsz * (dim + 1 + out_dim)
                            + prepared["w1xT"].size + prepared["w1tT"].size
                            + prepared["wmidT"].size + prepared["bh"].size
                            + prepared["w5T"].size + prepared["b5T"].size),
    )

    outT = pl.pallas_call(
        _mlp_kernel,
        out_shape=jax.ShapeDtypeStruct((out_dim, bsz), jnp.float32),
        grid=grid,
        in_specs=[
            pl.BlockSpec((dim, tm), lambda i: (0, i)),   # x^T (streamed, lane-dense)
            pl.BlockSpec((1, tm), lambda i: (0, i)),     # t^T (streamed)
            resident(prepared["w1xT"]),                  # (H, dim)
            resident(prepared["w1tT"]),                  # (H, 1)
            resident(prepared["wmidT"]),                 # (3, H, H)
            resident(prepared["bh"]),                    # (4, H, 1)
            resident(prepared["w5T"]),                   # (out_dim, H)
            resident(prepared["b5T"]),                   # (out_dim, 1)
        ],
        out_specs=pl.BlockSpec((out_dim, tm), lambda i: (0, i)),
        compiler_params=pltpu.CompilerParams(dimension_semantics=("parallel",)),
        cost_estimate=cost,
    )(xT, tT, prepared["w1xT"], prepared["w1tT"], prepared["wmidT"],
      prepared["bh"], prepared["w5T"], prepared["b5T"])

    return jnp.transpose(outT)     # back to (bsz, dim)


def init_params(key, input_dim, output_dim, hidden_dim=32):
    """Deterministic parameter init. Weights stored as (in, out); biases as (1, out)."""
    dims = [(input_dim + 1, hidden_dim),
            (hidden_dim, hidden_dim),
            (hidden_dim, hidden_dim),
            (hidden_dim, hidden_dim),
            (hidden_dim, output_dim)]
    params = []
    for (din, dout) in dims:
        key, kw, kb = jax.random.split(key, 3)
        bound = 1.0 / jnp.sqrt(din)
        w = jax.random.uniform(kw, (din, dout), jnp.float32, -bound, bound)
        b = jax.random.uniform(kb, (1, dout), jnp.float32, -bound, bound)
        params.append((w, b))
    return params


def reference_forward(x, t, params):
    h = jnp.concatenate([x, t[:, None]], axis=-1)
    for i, (w, b) in enumerate(params):
        h = h @ w + b
        if i < len(params) - 1:
            h = _gelu_exact(h)
    return h.reshape(x.shape)


if __name__ == "__main__":
    dim, hidden = 4, 32   # input_dim = output_dim = dim
    key = jax.random.PRNGKey(0)
    kx, kt, kp, kx2, kt2 = jax.random.split(key, 5)

    params = init_params(kp, input_dim=dim, output_dim=dim, hidden_dim=hidden)
    prepared = prepare_params(params, input_dim=dim)   # one-time packing (hoisted)
    jax.block_until_ready(prepared)

    fwd = jax.jit(model_forward)

    # Small-shape check (single full tile, matches the module's tiny example size).
    bsz = 8
    x = jax.random.normal(kx, (bsz, dim), jnp.float32)
    t = jax.random.uniform(kt, (bsz,), jnp.float32)
    out = fwd(x, t, prepared)
    jax.block_until_ready(out)
    ref = reference_forward(x, t, params)
    assert out.shape == (bsz, dim)
    assert jnp.allclose(out, ref, atol=1e-5, rtol=1e-5), "mismatch vs pure-JAX reference"

    # Tiled-path check: 2 grid steps (both TCs on v7x) with a ragged last tile.
    bsz2 = 1000
    x2 = jax.random.normal(kx2, (bsz2, dim), jnp.float32)
    t2 = jax.random.uniform(kt2, (bsz2,), jnp.float32)
    out2 = fwd(x2, t2, prepared)
    jax.block_until_ready(out2)
    ref2 = reference_forward(x2, t2, params)
    assert out2.shape == (bsz2, dim)
    assert jnp.allclose(out2, ref2, atol=1e-5, rtol=1e-5), "mismatch (tiled path)"

    print("KERNEL_OK")
</pallas_src>

<mosaic_0001>
module attributes {stable_mosaic.version = 11 : i64} {
  func.func @_mlp_kernel(%arg0: i32, %arg1: memref<4x8xf32, #tpu.memory_space<vmem>>, %arg2: memref<1x8xf32, #tpu.memory_space<vmem>>, %arg3: memref<32x4xf32, #tpu.memory_space<vmem>>, %arg4: memref<32x1xf32, #tpu.memory_space<vmem>>, %arg5: memref<3x32x32xf32, #tpu.memory_space<vmem>>, %arg6: memref<4x32x1xf32, #tpu.memory_space<vmem>>, %arg7: memref<4x32xf32, #tpu.memory_space<vmem>>, %arg8: memref<4x1xf32, #tpu.memory_space<vmem>>, %arg9: memref<4x8xf32, #tpu.memory_space<vmem>>) attributes {dimension_semantics = [#tpu.dimension_semantics<parallel>], iteration_bounds = array<i64: 1>, scalar_prefetch = 0 : i64, scratch_operands = 0 : i64, tpu.core_type = #tpu.core_type<tc>, window_params = [{transform_indices = @transform_0, window_bounds = array<i64: 4, 8>}, {transform_indices = @transform_1, window_bounds = array<i64: 1, 8>}, {pipeline_mode = #tpu.pipeline_mode<synchronous>, transform_indices = @transform_2, window_bounds = array<i64: 32, 4>}, {pipeline_mode = #tpu.pipeline_mode<synchronous>, transform_indices = @transform_3, window_bounds = array<i64: 32, 1>}, {pipeline_mode = #tpu.pipeline_mode<synchronous>, transform_indices = @transform_4, window_bounds = array<i64: 3, 32, 32>}, {pipeline_mode = #tpu.pipeline_mode<synchronous>, transform_indices = @transform_5, window_bounds = array<i64: 4, 32, 1>}, {pipeline_mode = #tpu.pipeline_mode<synchronous>, transform_indices = @transform_6, window_bounds = array<i64: 4, 32>}, {pipeline_mode = #tpu.pipeline_mode<synchronous>, transform_indices = @transform_7, window_bounds = array<i64: 4, 1>}, {transform_indices = @transform_8, window_bounds = array<i64: 4, 8>}]} {
    %c0 = arith.constant 0 : index
    %c0_0 = arith.constant 0 : index
    %0 = vector.load %arg3[%c0, %c0_0] : memref<32x4xf32, #tpu.memory_space<vmem>>, vector<32x4xf32>
    %c0_1 = arith.constant 0 : index
    %c0_2 = arith.constant 0 : index
    %1 = vector.load %arg1[%c0_1, %c0_2] : memref<4x8xf32, #tpu.memory_space<vmem>>, vector<4x8xf32>
    %cst = arith.constant dense<0.000000e+00> : vector<32x8xf32>
    %2 = tpu.matmul %0, %1, %cst {dimension_numbers = #tpu.dot_dimension_numbers<[1], [0], [0], [1], [0, 0, 1, 1], [], []>} : vector<32x4xf32>, vector<4x8xf32>, vector<32x8xf32> -> vector<32x8xf32>
    %c0_3 = arith.constant 0 : index
    %c0_4 = arith.constant 0 : index
    %3 = vector.load %arg4[%c0_3, %c0_4] : memref<32x1xf32, #tpu.memory_space<vmem>>, vector<32x1xf32>
    %c0_5 = arith.constant 0 : index
    %c0_6 = arith.constant 0 : index
    %4 = vector.load %arg2[%c0_5, %c0_6] : memref<1x8xf32, #tpu.memory_space<vmem>>, vector<1x8xf32>
    %5 = vector.broadcast %3 : vector<32x1xf32> to vector<32x8xf32>
    %6 = vector.broadcast %4 : vector<1x8xf32> to vector<32x8xf32>
    %7 = arith.mulf %5, %6 : vector<32x8xf32>
    %8 = arith.addf %2, %7 : vector<32x8xf32>
    %c0_7 = arith.constant 0 : index
    %c0_8 = arith.constant 0 : index
    %c0_9 = arith.constant 0 : index
    %9 = vector.load %arg6[%c0_7, %c0_8, %c0_9] : memref<4x32x1xf32, #tpu.memory_space<vmem>>, vector<1x32x1xf32>
    %10 = vector.shape_cast %9 : vector<1x32x1xf32> to vector<32x1xf32>
    %11 = vector.broadcast %10 : vector<32x1xf32> to vector<32x8xf32>
    %12 = arith.addf %8, %11 : vector<32x8xf32>
    %cst_10 = arith.constant 5.000000e-01 : f32
    %13 = vector.broadcast %cst_10 : f32 to vector<32x8xf32>
    %14 = arith.mulf %13, %12 : vector<32x8xf32>
    %cst_11 = arith.constant 0.707106769 : f32
    %15 = vector.broadcast %cst_11 : f32 to vector<32x8xf32>
    %16 = arith.mulf %12, %15 : vector<32x8xf32>
    %17 = math.erf %16 : vector<32x8xf32>
    %cst_12 = arith.constant 1.000000e+00 : f32
    %18 = vector.broadcast %cst_12 : f32 to vector<32x8xf32>
    %19 = arith.addf %18, %17 : vector<32x8xf32>
    %20 = arith.mulf %14, %19 : vector<32x8xf32>
    %c0_13 = arith.constant 0 : index
    %c0_14 = arith.constant 0 : index
    %c0_15 = arith.constant 0 : index
    %21 = vector.load %arg5[%c0_13, %c0_14, %c0_15] : memref<3x32x32xf32, #tpu.memory_space<vmem>>, vector<1x32x32xf32>
    %22 = vector.shape_cast %21 : vector<1x32x32xf32> to vector<32x32xf32>
    %cst_16 = arith.constant dense<0.000000e+00> : vector<32x8xf32>
    %23 = tpu.matmul %22, %20, %cst_16 {dimension_numbers = #tpu.dot_dimension_numbers<[1], [0], [0], [1], [0, 0, 1, 1], [], []>} : vector<32x32xf32>, vector<32x8xf32>, vector<32x8xf32> -> vector<32x8xf32>
    %c1 = arith.constant 1 : index
    %c0_17 = arith.constant 0 : index
    %c0_18 = arith.constant 0 : index
    %24 = vector.load %arg6[%c1, %c0_17, %c0_18] : memref<4x32x1xf32, #tpu.memory_space<vmem>>, vector<1x32x1xf32>
    %25 = vector.shape_cast %24 : vector<1x32x1xf32> to vector<32x1xf32>
    %26 = vector.broadcast %25 : vector<32x1xf32> to vector<32x8xf32>
    %27 = arith.addf %23, %26 : vector<32x8xf32>
    %cst_19 = arith.constant 5.000000e-01 : f32
    %28 = vector.broadcast %cst_19 : f32 to vector<32x8xf32>
    %29 = arith.mulf %28, %27 : vector<32x8xf32>
    %cst_20 = arith.constant 0.707106769 : f32
    %30 = vector.broadcast %cst_20 : f32 to vector<32x8xf32>
    %31 = arith.mulf %27, %30 : vector<32x8xf32>
    %32 = math.erf %31 : vector<32x8xf32>
    %cst_21 = arith.constant 1.000000e+00 : f32
    %33 = vector.broadcast %cst_21 : f32 to vector<32x8xf32>
    %34 = arith.addf %33, %32 : vector<32x8xf32>
    %35 = arith.mulf %29, %34 : vector<32x8xf32>
    %c1_22 = arith.constant 1 : index
    %c0_23 = arith.constant 0 : index
    %c0_24 = arith.constant 0 : index
    %36 = vector.load %arg5[%c1_22, %c0_23, %c0_24] : memref<3x32x32xf32, #tpu.memory_space<vmem>>, vector<1x32x32xf32>
    %37 = vector.shape_cast %36 : vector<1x32x32xf32> to vector<32x32xf32>
    %cst_25 = arith.constant dense<0.000000e+00> : vector<32x8xf32>
    %38 = tpu.matmul %37, %35, %cst_25 {dimension_numbers = #tpu.dot_dimension_numbers<[1], [0], [0], [1], [0, 0, 1, 1], [], []>} : vector<32x32xf32>, vector<32x8xf32>, vector<32x8xf32> -> vector<32x8xf32>
    %c2 = arith.constant 2 : index
    %c0_26 = arith.constant 0 : index
    %c0_27 = arith.constant 0 : index
    %39 = vector.load %arg6[%c2, %c0_26, %c0_27] : memref<4x32x1xf32, #tpu.memory_space<vmem>>, vector<1x32x1xf32>
    %40 = vector.shape_cast %39 : vector<1x32x1xf32> to vector<32x1xf32>
    %41 = vector.broadcast %40 : vector<32x1xf32> to vector<32x8xf32>
    %42 = arith.addf %38, %41 : vector<32x8xf32>
    %cst_28 = arith.constant 5.000000e-01 : f32
    %43 = vector.broadcast %cst_28 : f32 to vector<32x8xf32>
    %44 = arith.mulf %43, %42 : vector<32x8xf32>
    %cst_29 = arith.constant 0.707106769 : f32
    %45 = vector.broadcast %cst_29 : f32 to vector<32x8xf32>
    %46 = arith.mulf %42, %45 : vector<32x8xf32>
    %47 = math.erf %46 : vector<32x8xf32>
    %cst_30 = arith.constant 1.000000e+00 : f32
    %48 = vector.broadcast %cst_30 : f32 to vector<32x8xf32>
    %49 = arith.addf %48, %47 : vector<32x8xf32>
    %50 = arith.mulf %44, %49 : vector<32x8xf32>
    %c2_31 = arith.constant 2 : index
    %c0_32 = arith.constant 0 : index
    %c0_33 = arith.constant 0 : index
    %51 = vector.load %arg5[%c2_31, %c0_32, %c0_33] : memref<3x32x32xf32, #tpu.memory_space<vmem>>, vector<1x32x32xf32>
    %52 = vector.shape_cast %51 : vector<1x32x32xf32> to vector<32x32xf32>
    %cst_34 = arith.constant dense<0.000000e+00> : vector<32x8xf32>
    %53 = tpu.matmul %52, %50, %cst_34 {dimension_numbers = #tpu.dot_dimension_numbers<[1], [0], [0], [1], [0, 0, 1, 1], [], []>} : vector<32x32xf32>, vector<32x8xf32>, vector<32x8xf32> -> vector<32x8xf32>
    %c3 = arith.constant 3 : index
    %c0_35 = arith.constant 0 : index
    %c0_36 = arith.constant 0 : index
    %54 = vector.load %arg6[%c3, %c0_35, %c0_36] : memref<4x32x1xf32, #tpu.memory_space<vmem>>, vector<1x32x1xf32>
    %55 = vector.shape_cast %54 : vector<1x32x1xf32> to vector<32x1xf32>
    %56 = vector.broadcast %55 : vector<32x1xf32> to vector<32x8xf32>
    %57 = arith.addf %53, %56 : vector<32x8xf32>
    %cst_37 = arith.constant 5.000000e-01 : f32
    %58 = vector.broadcast %cst_37 : f32 to vector<32x8xf32>
    %59 = arith.mulf %58, %57 : vector<32x8xf32>
    %cst_38 = arith.constant 0.707106769 : f32
    %60 = vector.broadcast %cst_38 : f32 to vector<32x8xf32>
    %61 = arith.mulf %57, %60 : vector<32x8xf32>
    %62 = math.erf %61 : vector<32x8xf32>
    %cst_39 = arith.constant 1.000000e+00 : f32
    %63 = vector.broadcast %cst_39 : f32 to vector<32x8xf32>
    %64 = arith.addf %63, %62 : vector<32x8xf32>
    %65 = arith.mulf %59, %64 : vector<32x8xf32>
    %c0_40 = arith.constant 0 : index
    %c0_41 = arith.constant 0 : index
    %66 = vector.load %arg7[%c0_40, %c0_41] : memref<4x32xf32, #tpu.memory_space<vmem>>, vector<4x32xf32>
    %cst_42 = arith.constant dense<0.000000e+00> : vector<4x8xf32>
    %67 = tpu.matmul %66, %65, %cst_42 {dimension_numbers = #tpu.dot_dimension_numbers<[1], [0], [0], [1], [0, 0, 1, 1], [], []>} : vector<4x32xf32>, vector<32x8xf32>, vector<4x8xf32> -> vector<4x8xf32>
    %c0_43 = arith.constant 0 : index
    %c0_44 = arith.constant 0 : index
    %68 = vector.load %arg8[%c0_43, %c0_44] : memref<4x1xf32, #tpu.memory_space<vmem>>, vector<4x1xf32>
    %69 = vector.broadcast %68 : vector<4x1xf32> to vector<4x8xf32>
    %70 = arith.addf %67, %69 : vector<4x8xf32>
    %c0_45 = arith.constant 0 : index
    %c0_46 = arith.constant 0 : index
    %71 = vector.load %arg9[%c0_45, %c0_46] : memref<4x8xf32, #tpu.memory_space<vmem>>, vector<4x8xf32>
    tpu.vector_store %arg9[%c0_45, %c0_46], %70 {strides = array<i32>} : memref<4x8xf32, #tpu.memory_space<vmem>>, vector<4x8xf32>,
    return
  }
  func.func @transform_0(%arg0: i32) -> (i32, i32) {
    %c0_i32 = arith.constant 0 : i32
    %c0_i32_0 = arith.constant 0 : i32
    return %c0_i32, %arg0 : i32, i32
  }
  func.func @transform_1(%arg0: i32) -> (i32, i32) {
    %c0_i32 = arith.constant 0 : i32
    %c0_i32_0 = arith.constant 0 : i32
    return %c0_i32, %arg0 : i32, i32
  }
  func.func @transform_2(%arg0: i32) -> (i32, i32) {
    %c0_i32 = arith.constant 0 : i32
    %c0_i32_0 = arith.constant 0 : i32
    %c0_i32_1 = arith.constant 0 : i32
    return %c0_i32, %c0_i32_0 : i32, i32
  }
  func.func @transform_3(%arg0: i32) -> (i32, i32) {
    %c0_i32 = arith.constant 0 : i32
    %c0_i32_0 = arith.constant 0 : i32
    %c0_i32_1 = arith.constant 0 : i32
    return %c0_i32, %c0_i32_0 : i32, i32
  }
  func.func @transform_4(%arg0: i32) -> (i32, i32, i32) {
    %c0_i32 = arith.constant 0 : i32
    %c0_i32_0 = arith.constant 0 : i32
    %c0_i32_1 = arith.constant 0 : i32
    %c0_i32_2 = arith.constant 0 : i32
    return %c0_i32, %c0_i32_0, %c0_i32_1 : i32, i32, i32
  }
  func.func @transform_5(%arg0: i32) -> (i32, i32, i32) {
    %c0_i32 = arith.constant 0 : i32
    %c0_i32_0 = arith.constant 0 : i32
    %c0_i32_1 = arith.constant 0 : i32
    %c0_i32_2 = arith.constant 0 : i32
    return %c0_i32, %c0_i32_0, %c0_i32_1 : i32, i32, i32
  }
  func.func @transform_6(%arg0: i32) -> (i32, i32) {
    %c0_i32 = arith.constant 0 : i32
    %c0_i32_0 = arith.constant 0 : i32
    %c0_i32_1 = arith.constant 0 : i32
    return %c0_i32, %c0_i32_0 : i32, i32
  }
  func.func @transform_7(%arg0: i32) -> (i32, i32) {
    %c0_i32 = arith.constant 0 : i32
    %c0_i32_0 = arith.constant 0 : i32
    %c0_i32_1 = arith.constant 0 : i32
    return %c0_i32, %c0_i32_0 : i32, i32
  }
  func.func @transform_8(%arg0: i32) -> (i32, i32) {
    %c0_i32 = arith.constant 0 : i32
    %c0_i32_0 = arith.constant 0 : i32
    return %c0_i32, %arg0 : i32, i32
  }
}

</mosaic_0001>

<bundles_post_ra>
// kernel: model_forward.1
= control target key start
LH: loop header
LB: loop body
LE: loop exit
PB: predicated region body
PF: predicated region fallthrough
CT: control target
= control target key end

     0   :  { %vm83_vm0 = vcmask 1043456   ;;  %vm70_vm1 = vcmask 31744   ;;  %v984_v5 = vmov 0   ;;  %s1183_s0 = inlined_call_operand.vmem [shape: f32[4,8], index: 0, kind: input, shape index: {}]   ;;  %s1184_s1 = inlined_call_operand.vmem [shape: f32[1,8], index: 1, kind: input, shape index: {}]   ;;  %s1185_s2 = inlined_call_operand.vmem [shape: f32[32,4], index: 2, kind: input, shape index: {}]   ;;  %s1186_s3 = inlined_call_operand.vmem [shape: f32[32,1], index: 3, kind: input, shape index: {}]   ;;  %s1187_s4 = inlined_call_operand.vmem [shape: f32[3,32,32], index: 4, kind: input, shape index: {}]   ;;  %s1188_s5 = inlined_call_operand.vmem [shape: f32[4,32,1], index: 5, kind: input, shape index: {}]   ;;  %s1189_s6 = inlined_call_operand.vmem [shape: f32[4,32], index: 6, kind: input, shape index: {}]   ;;  %s1190_s7 = inlined_call_operand.vmem [shape: f32[4,1], index: 7, kind: input, shape index: {}]   ;;  %s1191_s8 = inlined_call_operand.hbm [shape: f32[4,8], index: 8, kind: output, shape index: {}]  }
   0x1   :  { %v34_v0 = vld [vmem:[%s1183_s0] sm:$0xf]  ;;  %v31_v2 = vld [vmem:[%s1185_s2 + $0x8] sm:$0xff]  ;;  %v32_v3 = vld [vmem:[%s1185_s2 + $0x10] sm:$0xff]  ;;  %926 = vset.pattern.permute.xlu0 %v984_v5  ;;  %927 = vset.pattern.permute.xlu1 %v984_v5 }
   0x2   :  { %v30_v1 = vld [vmem:[%s1185_s2] sm:$0xff]  ;;  %830 = vmatprep.subr.msk.mxu0 %vm83_vm0, %v34_v0  ;;  %v37_v6 = vld [vmem:[%s1186_s3 + $0x10] sm:$0xff]  ;;  %v33_v7 = vld [vmem:[%s1185_s2 + $0x18] sm:$0xff] }
   0x3   :  { %832 = vmatprep.mubr.msk.f32.mxu0 %vm70_vm1, %v30_v1  ;;  %v35_v4 = vld [vmem:[%s1186_s3] sm:$0xff]  ;;  %831 = vmatpush3.msk.msra.mxu0 %vm83_vm0, %v34_v0  ;;  %v36_v8 = vld [vmem:[%s1186_s3 + $0x8] sm:$0xff]  ;;  %v38_v9 = vld [vmem:[%s1186_s3 + $0x18] sm:$0xff] }
   0x4   :  { %833 = vmatmul.mubr.msk.f32.vlgmr.msra.gmra.mrb[0].mxu0 %vm70_vm1, %v31_v2  ;;  %42 = vperm.xlu0 %926, %v35_v4   ;;  %v172_v10 = vld [vmem:[%s1188_s5] sm:$0xff] }
   0x5   :  { %835 = vmatprep.mubr.msk.f32.mxu0 %vm70_vm1, %v32_v3  ;;  %52 = vperm.xlu1 %927, %v37_v6  }
   0x8   :  { %836 = vmatmul.mubr.msk.f32.gmra.mrb[2].mxu0 %vm70_vm1, %v33_v7  ;;  %47 = vperm.xlu0 %926, %v36_v8  }
   0x9   :  { %57 = vperm.xlu1 %927, %v38_v9  }
   0xa   :  { %13 = vsyncpa [#allocation3], 0  ;;  %v173_v11 = vld [vmem:[%s1188_s5 + $0x8] sm:$0xff]  ;;  %v174_v12 = vld [vmem:[%s1188_s5 + $0x10] sm:$0xff]  ;;  %vm249_vm2 = vcmask 261120   ;;  %vm986_vm3 = vmmov 0  }
   0xb   :  { %v175_v13 = vld [vmem:[%s1188_s5 + $0x18] sm:$0xff]  ;;  %v763_v14 = vld [vmem:[%s1188_s5 + $0x20] sm:$0xff]  ;;  %v764_v15 = vld [vmem:[%s1188_s5 + $0x28] sm:$0xff]  ;;  %s988_s28 = smov [#allocation2]   ;;  %vm741_vm4 = vcmask 60416  }
   0xc   :  { %178 = vperm.xlu0 %926, %v172_v10   ;;  %v765_v16 = vld [vmem:[%s1188_s5 + $0x30] sm:$0xff]  ;;  %v766_v17 = vld [vmem:[%s1188_s5 + $0x38] sm:$0xff]  ;;  %v775_v18 = vld [vmem:[%s1188_s5 + $0x40] sm:$0xff]  ;;  %s749_s29 = sshll.u32 %s988_s28, 4  ;;  %s750_s29 = int_to_ptr.vmem [resolvable:$true] %s749_s29 }
   0xd   :  { %183 = vperm.xlu1 %927, %v173_v11   ;;  %v776_v19 = vld [vmem:[%s1188_s5 + $0x48] sm:$0xff]  ;;  %v777_v20 = vld [vmem:[%s1188_s5 + $0x50] sm:$0xff]  ;;  %v778_v21 = vld [vmem:[%s1188_s5 + $0x58] sm:$0xff]  ;;  %s960_s30 = scalar_lea.vmem %s750_s29, 64  ;;  %p965_p1 = scmp.lt.s32.totalorder %s750_s29, %s750_s29 }
   0xe   :  { %v787_v22 = vld [vmem:[%s1188_s5 + $0x60] sm:$0xff]  ;;  %v788_v23 = vld [vmem:[%s1188_s5 + $0x68] sm:$0xff]  ;;  %v789_v24 = vld [vmem:[%s1188_s5 + $0x70] sm:$0xff]  ;;  %p961_p0 = scmp.ne.s32.totalorder %s750_s29, %s960_s30  ;;  %p966_p2 = scmp.lt.s32.totalorder %s960_s30, %s960_s30 }
   0xf   :  { %v790_v25 = vld [vmem:[%s1188_s5 + $0x78] sm:$0xff]  ;;  %v662_v26 = vld [vmem:[%s1190_s7] sm:$0xf]  ;;  %v221_v11 = vld [vmem:[%s1187_s4 + $0x8] sm:$0xff] }
  0x10   :  { %188 = vperm.xlu0 %926, %v174_v12   ;;  %v220_v27 = vld [vmem:[%s1187_s4] sm:$0xff]  ;;  %v222_v12 = vld [vmem:[%s1187_s4 + $0x10] sm:$0xff]  ;;  %p967_p3 = por %p966_p2, %p965_p1 }
  0x11   :  { %193 = vperm.xlu1 %927, %v175_v13   ;;  %846 = vmatprep.mubr.msk.f32.mxu1 %vm249_vm2, %v220_v27  ;;  %v757_v32 = vld [vmem:[%s1184_s1] ss:$0 sm:$0xff]  ;;  %v223_v13 = vld [vmem:[%s1187_s4 + $0x18] sm:$0xff] }
  0x12   :  { %p968_p4 = pnand %p967_p3, %p961_p0 }
  0x14   :  { %231 = vperm.xlu0 %926, %v763_v14   ;;  %v771_v14 = vld [vmem:[%s1187_s4 + $0x20] sm:$0xff] }
  0x15   :  { %236 = vperm.xlu1 %927, %v764_v15   ;;  %860 = vmatprep.mubr.msk.f32.mxu0 %vm249_vm2, %v771_v14 }
  0x18   :  { %241 = vperm.xlu0 %926, %v765_v16  }
  0x19   :  { %246 = vperm.xlu1 %927, %v766_v17  }
  0x1c   :  { %379 = vperm.xlu0 %926, %v775_v18  }
  0x1d   :  { %384 = vperm.xlu1 %927, %v776_v19  }
  0x20   :  { %389 = vperm.xlu0 %926, %v777_v20  }
  0x21   :  { %394 = vperm.xlu1 %927, %v778_v21  }
  0x24   :  { %526 = vperm.xlu0 %926, %v787_v22  }
  0x25   :  { %531 = vperm.xlu1 %927, %v788_v23  }
  0x28   :  { %536 = vperm.xlu0 %926, %v789_v24  }
  0x29   :  { %541 = vperm.xlu1 %927, %v790_v25  }
  0x2c   :  { %665 = vperm.xlu0 %926, %v662_v26  }
  0x83   :  { %v43_v29 = vpop.permute.xlu0 %42 }
  0x84   :  { %v53_v28 = vpop.permute.xlu1 %52  ;;  %v66_v34 = vmul.f32 %v757_v32, %v43_v29 }
  0x85   :  { %v68_v43 = vmul.f32 %v757_v32, %v53_v28 }
  0x87   :  { %v48_v31 = vpop.permute.xlu0 %47 }
  0x88   :  { %v58_v30 = vpop.permute.xlu1 %57  ;;  %v67_v33 = vmul.f32 %v757_v32, %v48_v31 }
  0x89   :  { %v69_v41 = vmul.f32 %v757_v32, %v58_v30 }
  0x8b   :  { %v179_v37 = vpop.permute.xlu0 %178 }
  0x8c   :  { %v184_v35 = vpop.permute.xlu1 %183 }
  0x8f   :  { %v189_v52 = vpop.permute.xlu0 %188 }
  0x90   :  { %v194_v49 = vpop.permute.xlu1 %193 }
  0x93   :  { %v232_v16 = vpop.permute.xlu0 %231 }
  0x94   :  { %v237_v15 = vpop.permute.xlu1 %236 }
  0x97   :  { %v242_v25 = vpop.permute.xlu0 %241 }
  0x98   :  { %v247_v22 = vpop.permute.xlu1 %246 }
  0xd7   :  { %v834_v36 = vpop.f32.mrb[0].mxu0 }
  0xd8   :  { %v159_v38 = vadd.f32 %v834_v36, %v67_v33  ;;  %v153_v39 = vpop.f32.mrb[1].mxu0 }
  0xd9   :  { %v154_v40 = vadd.f32 %v153_v39, %v66_v34 }
  0xda   :  { %v197_v42 = vadd.f32 %v184_v35, %v159_v38 }
  0xdb   :  { %v196_v44 = vadd.f32 %v179_v37, %v154_v40  ;;  %v837_v45 = vpop.f32.mrb[2].mxu0 }
  0xdc   :  { %v205_v46 = vmul.f32 0.70710677, %v197_v42  ;;  %v169_v47 = vadd.f32 %v837_v45, %v69_v41  ;;  %v163_v48 = vpop.f32.mrb[3].mxu0  ;;  %v201_v59 = vmul.f32 0.5, %v197_v42 }
  0xdd   :  { %v204_v50 = vmul.f32 0.70710677, %v196_v44  ;;  %v164_v51 = vadd.f32 %v163_v48, %v68_v43  ;;  %v200_v61 = vmul.f32 0.5, %v196_v44 }
  0xde   :  { %928 = verf.f32 %v205_v46  ;;  %v199_v53 = vadd.f32 %v194_v49, %v169_v47  ;;  %v772_v49 = vld [vmem:[%s1187_s4 + $0x28] sm:$0xff] }
  0xdf   :  { %930 = verf.f32 %v204_v50  ;;  %v198_v54 = vadd.f32 %v189_v52, %v164_v51  ;;  %v773_v50 = vld [vmem:[%s1187_s4 + $0x30] sm:$0xff]  ;;  %v774_v51 = vld [vmem:[%s1187_s4 + $0x38] sm:$0xff]  ;;  %v783_v52 = vld [vmem:[%s1187_s4 + $0x40] sm:$0xff] }
  0xe0   :  { %v207_v55 = vmul.f32 0.70710677, %v199_v53  ;;  %v203_v3 = vmul.f32 0.5, %v199_v53  ;;  %v385_v53 = vpop.permute.xlu1 %384 }
  0xe1   :  { %v206_v56 = vmul.f32 0.70710677, %v198_v54  ;;  %v202_v5 = vmul.f32 0.5, %v198_v54  ;;  %v380_v54 = vpop.permute.xlu0 %379 }
  0xe2   :  { %932 = verf.f32 %v207_v55 }
  0xe3   :  { %934 = verf.f32 %v206_v56 }
  0xe8   :  { %v929_v57 = vpop.eup %928 }
  0xe9   :  { %v931_v58 = vpop.eup %930  ;;  %v213_v60 = vadd.f32 1.0, %v929_v57 }
  0xea   :  { %v212_v62 = vadd.f32 1.0, %v931_v58 }
  0xeb   :  { %v217_v63 = vmul.f32 %v213_v60, %v201_v59  ;;  %v395_v60 = vpop.permute.xlu1 %394 }
  0xec   :  { %v933_v0 = vpop.eup %932  ;;  %v216_v1 = vmul.f32 %v212_v62, %v200_v61 }
  0xed   :  { %v935_v2 = vpop.eup %934  ;;  %v215_v4 = vadd.f32 1.0, %v933_v0 }
  0xee   :  { %v214_v6 = vadd.f32 1.0, %v935_v2  ;;  %v891_v7 = vpack.c.bf16 %v217_v63, %v216_v1  ;;  %v390_v63 = vpop.permute.xlu0 %389 }
  0xef   :  { %v219_v8 = vmul.f32 %v215_v4, %v203_v3 }
  0xf0   :  { %892 = vmatprep.subr.bf16.mxu1 %v891_v7  ;;  %v218_v9 = vmul.f32 %v214_v6, %v202_v5 }
  0xf1   :  { %894 = vmatpush3.bf16.msra.mxu1 %v891_v7 }
  0xf2   :  { %v895_v10 = vpack.c.bf16 %v219_v8, %v218_v9 }
  0xf4   :  { %896 = vmatprep.subr.bf16.mxu1 %v895_v10 }
  0xf5   :  { %898 = vmatpush3.bf16.msra.mxu1 %v895_v10 }
  0xf8   :  { %847 = vmatmul.mubr.msk.f32.vlgmr.msra.gmra.mrb[0].mxu1 %vm249_vm2, %v221_v11 }
  0xf9   :  { %849 = vmatprep.mubr.msk.f32.mxu1 %vm249_vm2, %v222_v12 }
  0xfc   :  { %850 = vmatmul.mubr.msk.f32.gmra.mrb[2].mxu1 %vm249_vm2, %v223_v13 }
  0xfd   :  { %874 = vmatprep.mubr.msk.f32.mxu1 %vm249_vm2, %v783_v52 }
 0x1cb   :  { %v848_v17 = vpop.f32.mrb[0].mxu1 }
 0x1cc   :  { %v334_v18 = vadd.f32 %v848_v17, %v237_v15  ;;  %v328_v19 = vpop.f32.mrb[1].mxu1 }
 0x1cd   :  { %v329_v20 = vadd.f32 %v328_v19, %v232_v16 }
 0x1ce   :  { %v352_v21 = vmul.f32 0.70710677, %v334_v18  ;;  %v348_v33 = vmul.f32 0.5, %v334_v18 }
 0x1cf   :  { %v351_v23 = vmul.f32 0.70710677, %v329_v20  ;;  %v851_v24 = vpop.f32.mrb[2].mxu1  ;;  %v347_v35 = vmul.f32 0.5, %v329_v20 }
 0x1d0   :  { %936 = verf.f32 %v352_v21  ;;  %v344_v26 = vadd.f32 %v851_v24, %v247_v22  ;;  %v338_v27 = vpop.f32.mrb[3].mxu1  ;;  %v785_v24 = vld [vmem:[%s1187_s4 + $0x50] sm:$0xff] }
 0x1d1   :  { %938 = verf.f32 %v351_v23  ;;  %v339_v28 = vadd.f32 %v338_v27, %v242_v25  ;;  %v784_v23 = vld [vmem:[%s1187_s4 + $0x48] sm:$0xff]  ;;  %v786_v25 = vld [vmem:[%s1187_s4 + $0x58] sm:$0xff]  ;;  %v987_v27 = vmov 0.0  }
 0x1d2   :  { %v354_v29 = vmul.f32 0.70710677, %v344_v26  ;;  %v350_v41 = vmul.f32 0.5, %v344_v26  ;;  %v985_v26 = vmov 0.0|0.0  }
 0x1d3   :  { %v353_v30 = vmul.f32 0.70710677, %v339_v28  ;;  %v349_v43 = vmul.f32 0.5, %v339_v28  ;;  %v532_v28 = vpop.permute.xlu1 %531 }
 0x1d4   :  { %940 = verf.f32 %v354_v29  ;;  %v527_v29 = vpop.permute.xlu0 %526 }
 0x1d5   :  { %942 = verf.f32 %v353_v30 }
 0x1da   :  { %v937_v31 = vpop.eup %936 }
 0x1db   :  { %v939_v32 = vpop.eup %938  ;;  %v360_v34 = vadd.f32 1.0, %v937_v31 }
 0x1dc   :  { %v359_v36 = vadd.f32 1.0, %v939_v32 }
 0x1dd   :  { %v364_v37 = vmul.f32 %v360_v34, %v348_v33 }
 0x1de   :  { %v941_v38 = vpop.eup %940  ;;  %v363_v39 = vmul.f32 %v359_v36, %v347_v35  ;;  %v542_v35 = vpop.permute.xlu1 %541 }
 0x1df   :  { %v943_v40 = vpop.eup %942  ;;  %v362_v42 = vadd.f32 1.0, %v941_v38  ;;  %v537_v38 = vpop.permute.xlu0 %536 }
 0x1e0   :  { %v361_v44 = vadd.f32 1.0, %v943_v40  ;;  %v899_v45 = vpack.c.bf16 %v364_v37, %v363_v39 }
 0x1e1   :  { %v366_v46 = vmul.f32 %v362_v42, %v350_v41 }
 0x1e2   :  { %v365_v47 = vmul.f32 %v361_v44, %v349_v43  ;;  %900 = vmatprep.subr.bf16.mxu0 %v899_v45 }
 0x1e3   :  { %902 = vmatpush3.bf16.msra.mxu0 %v899_v45 }
 0x1e4   :  { %v903_v48 = vpack.c.bf16 %v366_v46, %v365_v47 }
 0x1e6   :  { %904 = vmatprep.subr.bf16.mxu0 %v903_v48 }
 0x1e7   :  { %906 = vmatpush3.bf16.msra.mxu0 %v903_v48 }
 0x1e8   :  { %915 = vmatprep.subr.bf16.mxu0 %v985_v26 }
 0x1ea   :  { %861 = vmatmul.mubr.msk.f32.vlgmr.msra.gmra.mrb[4].mxu0 %vm249_vm2, %v772_v49 }
 0x1eb   :  { %863 = vmatprep.mubr.msk.f32.mxu0 %vm249_vm2, %v773_v50 }
 0x1ee   :  { %864 = vmatmul.mubr.msk.f32.gmra.mrb[6].mxu0 %vm249_vm2, %v774_v51 }
 0x1ef   :  { %888 = vmatprep.mubr.msk.f32.mxu0 %vm986_vm3, %v987_v27 }
 0x2bd   :  { %v862_v55 = vpop.f32.mrb[4].mxu0 }
 0x2be   :  { %v481_v56 = vadd.f32 %v862_v55, %v385_v53  ;;  %v475_v57 = vpop.f32.mrb[5].mxu0 }
 0x2bf   :  { %v476_v58 = vadd.f32 %v475_v57, %v380_v54 }
 0x2c0   :  { %v499_v59 = vmul.f32 0.70710677, %v481_v56  ;;  %v495_v7 = vmul.f32 0.5, %v481_v56 }
 0x2c1   :  { %v498_v61 = vmul.f32 0.70710677, %v476_v58  ;;  %v865_v62 = vpop.f32.mrb[6].mxu0  ;;  %v494_v9 = vmul.f32 0.5, %v476_v58 }
 0x2c2   :  { %944 = verf.f32 %v499_v59  ;;  %v491_v0 = vadd.f32 %v865_v62, %v395_v60  ;;  %v485_v1 = vpop.f32.mrb[7].mxu0  ;;  %v661_v62 = vld [vmem:[%s1189_s6] sm:$0xf] }
 0x2c3   :  { %946 = verf.f32 %v498_v61  ;;  %v486_v2 = vadd.f32 %v485_v1, %v390_v63  ;;  %v666_v63 = vpop.permute.xlu0 %665 }
 0x2c4   :  { %v501_v3 = vmul.f32 0.70710677, %v491_v0  ;;  %v497_v15 = vmul.f32 0.5, %v491_v0 }
 0x2c5   :  { %v500_v4 = vmul.f32 0.70710677, %v486_v2  ;;  %v496_v17 = vmul.f32 0.5, %v486_v2 }
 0x2c6   :  { %948 = verf.f32 %v501_v3 }
 0x2c7   :  { %950 = verf.f32 %v500_v4 }
 0x2cc   :  { %v945_v5 = vpop.eup %944 }
 0x2cd   :  { %v947_v6 = vpop.eup %946  ;;  %v507_v8 = vadd.f32 1.0, %v945_v5 }
 0x2ce   :  { %v506_v10 = vadd.f32 1.0, %v947_v6 }
 0x2cf   :  { %v511_v11 = vmul.f32 %v507_v8, %v495_v7 }
 0x2d0   :  { %v949_v12 = vpop.eup %948  ;;  %v510_v13 = vmul.f32 %v506_v10, %v494_v9 }
 0x2d1   :  { %v951_v14 = vpop.eup %950  ;;  %v509_v16 = vadd.f32 1.0, %v949_v12 }
 0x2d2   :  { %v508_v18 = vadd.f32 1.0, %v951_v14  ;;  %v907_v19 = vpack.c.bf16 %v511_v11, %v510_v13 }
 0x2d3   :  { %v513_v20 = vmul.f32 %v509_v16, %v497_v15 }
 0x2d4   :  { %v512_v21 = vmul.f32 %v508_v18, %v496_v17  ;;  %908 = vmatprep.subr.bf16.mxu1 %v907_v19 }
 0x2d5   :  { %910 = vmatpush3.bf16.msra.mxu1 %v907_v19 }
 0x2d6   :  { %v911_v22 = vpack.c.bf16 %v513_v20, %v512_v21 }
 0x2d8   :  { %912 = vmatprep.subr.bf16.mxu1 %v911_v22 }
 0x2d9   :  { %914 = vmatpush3.bf16.msra.mxu1 %v911_v22 }
 0x2dc   :  { %875 = vmatmul.mubr.msk.f32.vlgmr.msra.gmra.mrb[4].mxu1 %vm249_vm2, %v784_v23 }
 0x2dd   :  { %877 = vmatprep.mubr.msk.f32.mxu1 %vm249_vm2, %v785_v24 }
 0x2e0   :  { %878 = vmatmul.mubr.msk.f32.gmra.mrb[6].mxu1 %vm249_vm2, %v786_v25 }
 0x3af   :  { %v876_v30 = vpop.f32.mrb[4].mxu1 }
 0x3b0   :  { %v628_v31 = vadd.f32 %v876_v30, %v532_v28  ;;  %v622_v32 = vpop.f32.mrb[5].mxu1 }
 0x3b1   :  { %v623_v33 = vadd.f32 %v622_v32, %v527_v29 }
 0x3b2   :  { %v646_v34 = vmul.f32 0.70710677, %v628_v31  ;;  %v642_v46 = vmul.f32 0.5, %v628_v31 }
 0x3b3   :  { %v645_v36 = vmul.f32 0.70710677, %v623_v33  ;;  %v879_v37 = vpop.f32.mrb[6].mxu1  ;;  %v641_v48 = vmul.f32 0.5, %v623_v33 }
 0x3b4   :  { %952 = verf.f32 %v646_v34  ;;  %v638_v39 = vadd.f32 %v879_v37, %v542_v35  ;;  %v632_v40 = vpop.f32.mrb[7].mxu1 }
 0x3b5   :  { %954 = verf.f32 %v645_v36  ;;  %v633_v41 = vadd.f32 %v632_v40, %v537_v38 }
 0x3b6   :  { %v648_v42 = vmul.f32 0.70710677, %v638_v39  ;;  %v644_v54 = vmul.f32 0.5, %v638_v39 }
 0x3b7   :  { %v647_v43 = vmul.f32 0.70710677, %v633_v41  ;;  %v643_v57 = vmul.f32 0.5, %v633_v41 }
 0x3b8   :  { %956 = verf.f32 %v648_v42 }
 0x3b9   :  { %958 = verf.f32 %v647_v43 }
 0x3be   :  { %v953_v44 = vpop.eup %952 }
 0x3bf   :  { %v955_v45 = vpop.eup %954  ;;  %v654_v47 = vadd.f32 1.0, %v953_v44 }
 0x3c0   :  { %v653_v49 = vadd.f32 1.0, %v955_v45 }
 0x3c1   :  { %v658_v50 = vmul.f32 %v654_v47, %v642_v46 }
 0x3c2   :  { %v957_v51 = vpop.eup %956  ;;  %v657_v52 = vmul.f32 %v653_v49, %v641_v48 }
 0x3c3   :  { %v959_v53 = vpop.eup %958  ;;  %v656_v55 = vadd.f32 1.0, %v957_v51 }
 0x3c4   :  { %v916_v56 = vpack.c.bf16 %v658_v50, %v657_v52  ;;  %v655_v58 = vadd.f32 1.0, %v959_v53 }
 0x3c5   :  { %v660_v59 = vmul.f32 %v656_v55, %v644_v54 }
 0x3c6   :  { %v659_v60 = vmul.f32 %v655_v58, %v643_v57  ;;  %917 = vmatpush3.bf16.msra.mxu0 %v916_v56 }
 0x3c7   :  { %918 = vmatprep.subr.bf16.mxu0 %v985_v26 }
 0x3c8   :  { %v919_v61 = vpack.c.bf16 %v660_v59, %v659_v60 }
 0x3ca   :  { %920 = vmatpush3.bf16.msra.mxu0 %v919_v61 }
 0x3cd   :  { %889 = vmatmul.mubr.msk.f32.vlgmr.msra.gmra.mrb[8].mxu0 %vm249_vm2, %v661_v62 }
 0x4a0   :  { %v737_v0 = vpop.f32.mrb[8].mxu0 }
 0x4a1   :  { %v738_v1 = vadd.f32 %v737_v0, %v666_v63  ;;  %v890_v2 = vpop.f32.mrb[9].mxu0 }
 0x4a3   :  { %742 = vst.msk [vmem:[#allocation2] sm:$0xf] %vm741_vm4, %v738_v1 }
 0x4a4   :  { %971 = shalt.err (!%p968_p4)
}
 0x4a5   :  { %s972_s5 = scalar_lea.hbm %s1191_s8, 64 }
 0x4a6   :  { %p973_p5 = scmp.ne.s32.totalorder %s1191_s8, %s972_s5  ;;  %p976_p6 = scmp.lt.u32.totalorder %s972_s5, %s1191_s8 }
 0x4a8   :  { %p978_p7 = pnand %p976_p6, %p973_p5 }
 0x4aa   :  { %981 = shalt.err (!%p978_p7)
}
 0x4ab   :  { %752 = dma.vmem_to_hbm [thread:$0]  %s750_s29, 64, %s1191_s8, [#allocation3]  }
 0x4ac   :  { %982 = dma.done.wait [#allocation3], 64  }
 0x4ad   :  { %983 = vsyncadd [#allocation3], 4294967232 }
 0x4ae   :  { %756 = vsyncpa [#allocation3], 1 }

</bundles_post_ra>
